<compile_context>
chip_gen: v5e
topology: v5e:2x2
jax: 0.10.0
libtpu: 0.0.40
codegen_flags: <defaults>
</compile_context>

<pallas_src>
import functools
import itertools
import math
from dataclasses import dataclass, field

import jax
import jax.numpy as jnp
from jax.experimental import pallas as pl
from jax.experimental.pallas import tpu as pltpu

_EPS = 1e-12

# ----------------------------------------------------------------------------- #
# small helpers
# ----------------------------------------------------------------------------- #
def _rup(x, m=128):
    return ((x + m - 1) // m) * m


def _pad1(x, c):
    return jnp.pad(x, (0, c - x.shape[0]))


def _pad2(x, r, c):
    return jnp.pad(x, ((0, r - x.shape[0]), (0, c - x.shape[1])))


def _pad_last(x, target):
    pad = target - x.shape[-1]
    if pad <= 0:
        return x
    return jnp.pad(x, [(0, 0)] * (x.ndim - 1) + [(0, pad)])


@functools.lru_cache(maxsize=None)
def _weight_pipeline_mode():
    """Return pl.Buffered(1) if single-buffered constant-index weight blocks are
    supported by this jax/pallas build, else None (default double buffering)."""
    try:
        def k(x_ref, w_ref, o_ref):
            o_ref[...] = x_ref[...] + w_ref[...]

        spec_w = pl.BlockSpec((8, 128), lambda i: (0, 0), pipeline_mode=pl.Buffered(1))
        fn = pl.pallas_call(
            k,
            out_shape=jax.ShapeDtypeStruct((16, 128), jnp.float32),
            grid=(2,),
            in_specs=[pl.BlockSpec((8, 128), lambda i: (i, 0)), spec_w],
            out_specs=pl.BlockSpec((8, 128), lambda i: (i, 0)),
        )
        jax.block_until_ready(fn(jnp.zeros((16, 128), jnp.float32),
                                 jnp.ones((8, 128), jnp.float32)))
        return pl.Buffered(1)
    except Exception:
        return None


def _weight_spec(shape, index_map):
    """BlockSpec for a constant (weight-like) input; single-buffered when possible."""
    mode = _weight_pipeline_mode()
    if mode is None:
        return pl.BlockSpec(shape, index_map)
    return pl.BlockSpec(shape, index_map, pipeline_mode=mode)


# ----------------------------------------------------------------------------- #
# in-kernel math helpers (operate on VALUES already loaded from refs)
# ----------------------------------------------------------------------------- #
def _ln(x, g, b, d_true):
    """LayerNorm over the last (lane) dim; padding lanes of x/g/b are zero so the
    padded-width sums with 1/d_true are exact.  Variance clamped >= 0."""
    inv_d = 1.0 / float(d_true)
    mu = jnp.sum(x, axis=-1, keepdims=True) * inv_d
    ex2 = jnp.sum(x * x, axis=-1, keepdims=True) * inv_d
    var = jnp.maximum(ex2 - mu * mu, 0.0)
    return (x - mu) * jax.lax.rsqrt(var + _EPS) * g + b


def _softmax_rows(s):
    s = s - jnp.max(s, axis=-1, keepdims=True)
    p = jnp.exp(s)
    return p * pl.reciprocal(jnp.sum(p, axis=-1, keepdims=True), approx=True)


def _mha(q, k, v, *, num_heads, dh_q, dh_v):
    """Multi-head attention with 2 MXU matmuls total.  q already carries the
    1/sqrt(dh) scale (folded into wq at prep time).  Pad lanes are zero."""
    n_rows = q.shape[0]
    qk_pad = q.shape[1]
    v_pad = v.shape[1]
    kb = k.astype(jnp.bfloat16)
    vb = v.astype(jnp.bfloat16)

    if num_heads == 1:
        s = jax.lax.dot_general(q.astype(jnp.bfloat16), kb, (((1,), (1,)), ((), ())),
                                preferred_element_type=jnp.float32)
        p = _softmax_rows(s)
        return jnp.dot(p.astype(jnp.bfloat16), vb, preferred_element_type=jnp.float32)

    # Batched heads: mask Q per head in f32 (v5e-friendly), stack the head blocks
    # along the row (sublane) axis, then ONE score matmul and ONE P@V matmul.
    lane_q = jax.lax.broadcasted_iota(jnp.int32, (1, qk_pad), 1)
    lane_v = jax.lax.broadcasted_iota(jnp.int32, (1, v_pad), 1)
    q_blocks = []
    for h in range(num_heads):
        qm = ((lane_q >= h * dh_q) & (lane_q < (h + 1) * dh_q)).astype(jnp.float32)
        q_blocks.append(q * qm)
    q_stack = jnp.concatenate(q_blocks, axis=0).astype(jnp.bfloat16)       # (H*N, qkp)

    s = jax.lax.dot_general(q_stack, kb, (((1,), (1,)), ((), ())),
                            preferred_element_type=jnp.float32)            # (H*N, M)
    p = _softmax_rows(s)
    ctx_stack = jnp.dot(p.astype(jnp.bfloat16), vb,
                        preferred_element_type=jnp.float32)                # (H*N, vp)

    ctx = jnp.zeros((n_rows, v_pad), jnp.float32)
    for h in range(num_heads):
        vm = ((lane_v >= h * dh_v) & (lane_v < (h + 1) * dh_v)).astype(jnp.float32)
        ctx = ctx + ctx_stack[h * n_rows:(h + 1) * n_rows, :] * vm
    return ctx


CROSS_W_KEYS = ("ln1_g", "ln1_b", "ln2_g", "ln2_b", "wq", "bq", "wkv", "bkv",
                "wo", "bo", "lnm_g", "lnm_b", "w1", "b1", "w2", "b2")
SELF_W_KEYS = ("ln1_g", "ln1_b", "wqkv", "bqkv", "wo", "bo",
               "lnm_g", "lnm_b", "w1", "b1", "w2", "b2")
DEC_W_KEYS = CROSS_W_KEYS + ("fw", "fb")


def _cross_layer_fwd(h, kv, w, *, num_heads, dh_q, dh_v, d_q, d_kv, qk_pad,
                     use_query_residual):
    (ln1_g, ln1_b, ln2_g, ln2_b, wq, bq, wkv, bkv, wo, bo,
     lnm_g, lnm_b, w1, b1, w2, b2) = w
    h_ln = _ln(h, ln1_g, ln1_b, d_q)
    kv_ln = _ln(kv, ln2_g, ln2_b, d_kv)
    q = jnp.dot(h_ln.astype(jnp.bfloat16), wq, preferred_element_type=jnp.float32) + bq
    kvp = jnp.dot(kv_ln.astype(jnp.bfloat16), wkv, preferred_element_type=jnp.float32) + bkv
    k = kvp[:, :qk_pad]
    v = kvp[:, qk_pad:]
    ctx = _mha(q, k, v, num_heads=num_heads, dh_q=dh_q, dh_v=dh_v)
    attn = jnp.dot(ctx.astype(jnp.bfloat16), wo, preferred_element_type=jnp.float32) + bo
    if use_query_residual:
        attn = attn + h
    mlp_in = _ln(attn, lnm_g, lnm_b, d_q)
    h1 = jnp.dot(mlp_in.astype(jnp.bfloat16), w1, preferred_element_type=jnp.float32) + b1
    # TODO(synk): HF Perceiver 'gelu' is erf-based; tanh approximation keeps the
    # transcendental on the EUP and lowers cleanly in Mosaic.
    h1 = jax.nn.gelu(h1, approximate=True)
    h2 = jnp.dot(h1.astype(jnp.bfloat16), w2, preferred_element_type=jnp.float32) + b2
    return h2 + attn


def _self_layer_fwd(h, w, *, num_heads, dh_q, dh_v, d_q, qk_pad):
    (ln1_g, ln1_b, wqkv, bqkv, wo, bo, lnm_g, lnm_b, w1, b1, w2, b2) = w
    h_ln = _ln(h, ln1_g, ln1_b, d_q)
    qkv = jnp.dot(h_ln.astype(jnp.bfloat16), wqkv,
                  preferred_element_type=jnp.float32) + bqkv                # packed QKV
    q = qkv[:, :qk_pad]
    k = qkv[:, qk_pad:2 * qk_pad]
    v = qkv[:, 2 * qk_pad:]
    ctx = _mha(q, k, v, num_heads=num_heads, dh_q=dh_q, dh_v=dh_v)
    attn = jnp.dot(ctx.astype(jnp.bfloat16), wo,
                   preferred_element_type=jnp.float32) + bo + h             # query residual
    mlp_in = _ln(attn, lnm_g, lnm_b, d_q)
    h1 = jnp.dot(mlp_in.astype(jnp.bfloat16), w1, preferred_element_type=jnp.float32) + b1
    h1 = jax.nn.gelu(h1, approximate=True)
    h2 = jnp.dot(h1.astype(jnp.bfloat16), w2, preferred_element_type=jnp.float32) + b2
    return h2 + attn


# ----------------------------------------------------------------------------- #
# Pallas kernel 1: fused Conv(im2col matmul) + BN(eval, folded) + ReLU
# ----------------------------------------------------------------------------- #
def _conv_bn_relu_kernel(p_ref, w_ref, t_ref, o_ref):
    y = jnp.dot(p_ref[...], w_ref[...], preferred_element_type=jnp.float32)
    o_ref[...] = jnp.maximum(y + t_ref[...], 0.0)


def _im2col(x, k=7, stride=2, pad=3):
    # TODO(synk): host-side im2col materializes k*k shifted copies; for large
    # images replace with in-kernel shifted-window DMAs or lax.conv + epilogue.
    B, C, H, W = x.shape
    xp = jnp.pad(x, ((0, 0), (0, 0), (pad, pad), (pad, pad)))
    Ho = (H + 2 * pad - k) // stride + 1
    Wo = (W + 2 * pad - k) // stride + 1
    cols = []
    for i in range(k):
        for j in range(k):
            cols.append(xp[:, :, i:i + stride * Ho:stride, j:j + stride * Wo:stride])
    col = jnp.stack(cols, axis=2)                 # (B, C, k*k, Ho, Wo)
    col = col.reshape(B, C * k * k, Ho, Wo)       # (c, kh, kw) ordering == torch flatten
    return col, Ho, Wo


def downsample_rgb(pc, x):
    """Conv2d(3,C,k7,s2,p3) -> BatchNorm2d(eval) -> ReLU -> MaxPool2d(2,2)."""
    B, C, H, W = x.shape
    col, Ho, Wo = _im2col(x)
    patches = col.transpose(0, 2, 3, 1).reshape(B * Ho * Wo, C * 49).astype(jnp.bfloat16)
    M = patches.shape[0]
    K, Cp, Cout = pc["K"], pc["Cp"], pc["Cout"]          # K stays at 147 (no lane padding)

    tm = 512 if M >= 512 else _rup(M, 8)
    Mp = _rup(M, tm)
    if Mp != M:
        patches = jnp.pad(patches, ((0, Mp - M), (0, 0)))

    y = pl.pallas_call(
        _conv_bn_relu_kernel,
        out_shape=jax.ShapeDtypeStruct((Mp, Cp), jnp.float32),
        grid=(Mp // tm,),
        in_specs=[
            pl.BlockSpec((tm, K), lambda i: (i, 0)),               # full-array K dim
            _weight_spec((K, Cp), lambda i: (0, 0)),
            _weight_spec((1, Cp), lambda i: (0, 0)),
        ],
        out_specs=pl.BlockSpec((tm, Cp), lambda i: (i, 0)),
        compiler_params=pltpu.CompilerParams(dimension_semantics=("parallel",)),
    )(patches, pc["w"], pc["shift"])

    y = y[:M, :Cout].reshape(B, Ho, Wo, Cout).transpose(0, 3, 1, 2)     # NCHW
    y = y.reshape(B, Cout, Ho // 2, 2, Wo // 2, 2).max(axis=(3, 5))     # MaxPool 2x2
    return y


# ----------------------------------------------------------------------------- #
# Pallas kernel 2: fused Perceiver ENCODER
#   (cross-attention onto latents + all self-attend layers, latent stays in VMEM)
# ----------------------------------------------------------------------------- #
def _encoder_kernel(*refs, num_self_layers, cross_heads, self_heads, d_q, d_kv,
                    cross_dh_q, cross_dh_v, self_dh_q, self_dh_v,
                    cross_qk_pad, self_qk_pad):
    n_c, n_s = len(CROSS_W_KEYS), len(SELF_W_KEYS)
    kv_ref, lat_ref = refs[0], refs[1]
    cross_refs = refs[2:2 + n_c]
    self_refs = refs[2 + n_c:2 + n_c + n_s]
    o_ref = refs[2 + n_c + n_s]

    kv = kv_ref[0].astype(jnp.float32)          # (M, dkv_pad)
    h = lat_ref[...].astype(jnp.float32)        # (num_latents, dq_pad)

    cross_w = tuple(r[...] for r in cross_refs)
    h = _cross_layer_fwd(h, kv, cross_w, num_heads=cross_heads,
                         dh_q=cross_dh_q, dh_v=cross_dh_v, d_q=d_q, d_kv=d_kv,
                         qk_pad=cross_qk_pad, use_query_residual=True)

    for l in range(num_self_layers):            # static unroll over stacked weights
        w_l = tuple(r[l] for r in self_refs)
        h = _self_layer_fwd(h, w_l, num_heads=self_heads,
                            dh_q=self_dh_q, dh_v=self_dh_v, d_q=d_q,
                            qk_pad=self_qk_pad)

    o_ref[0] = h


def encode_latent(prep, cfg, all_emb):
    """all_emb: (B, M, d_kv) f32 -> latent (B, num_latents, dq_pad) f32."""
    ec, ss = prep["enc_cross"], prep["self_stack"]
    B, M, _ = all_emb.shape
    dkvp = ec["dkv_pad"]
    kv_pad = _pad_last(all_emb, dkvp).astype(jnp.bfloat16)      # bf16 activations in HBM
    lat = prep["latents_pad"]                                   # (n_lat, dq_pad) f32
    n_lat, dqp = lat.shape

    cross_args = [ec[k] for k in CROSS_W_KEYS]
    self_args = [ss[k] for k in SELF_W_KEYS]

    in_specs = ([pl.BlockSpec((1, M, dkvp), lambda b: (b, 0, 0)),
                 _weight_spec(lat.shape, lambda b, _n=lat.ndim: (0,) * _n)]
                + [_weight_spec(a.shape, lambda b, _n=a.ndim: (0,) * _n)
                   for a in cross_args]
                + [_weight_spec(a.shape, lambda b, _n=a.ndim: (0,) * _n)
                   for a in self_args])

    kernel = functools.partial(
        _encoder_kernel,
        num_self_layers=ss["num_layers"],
        cross_heads=ec["num_heads"], self_heads=ss["num_heads"],
        d_q=ec["d_q"], d_kv=ec["d_kv"],
        cross_dh_q=ec["qk"] // ec["num_heads"], cross_dh_v=ec["vch"] // ec["num_heads"],
        self_dh_q=ss["qk"] // ss["num_heads"], self_dh_v=ss["vch"] // ss["num_heads"],
        cross_qk_pad=ec["qk_pad"], self_qk_pad=ss["qk_pad"])

    return pl.pallas_call(
        kernel,
        out_shape=jax.ShapeDtypeStruct((B, n_lat, dqp), jnp.float32),
        grid=(B,),
        in_specs=in_specs,
        out_specs=pl.BlockSpec((1, n_lat, dqp), lambda b: (b, 0, 0)),
        compiler_params=pltpu.CompilerParams(dimension_semantics=("parallel",)),
    )(kv_pad, lat, *cross_args, *self_args)


# ----------------------------------------------------------------------------- #
# Pallas kernel 3: batched Perceiver DECODER
#   all views x all task heads in one call; task weights stacked along axis 0
#   and selected with pl.program_id(0); query rows tiled.
# ----------------------------------------------------------------------------- #
def _decoder_kernel(*refs, num_heads, d_q, d_kv, dh_q, dh_v, qk_pad):
    n_w = len(DEC_W_KEYS)
    q_ref, lat_ref = refs[0], refs[1]
    w_refs = refs[2:2 + n_w]
    o_ref = refs[2 + n_w]
    t = pl.program_id(0)                        # task-head index

    h = q_ref[0].astype(jnp.float32)            # (tn, dq_pad)
    kv = lat_ref[0].astype(jnp.float32)         # (num_latents, dkv_pad)

    w = tuple(w_refs[i][t] for i in range(len(CROSS_W_KEYS)))
    fw = w_refs[len(CROSS_W_KEYS)][t]
    fb = w_refs[len(CROSS_W_KEYS) + 1][t]

    out = _cross_layer_fwd(h, kv, w, num_heads=num_heads, dh_q=dh_q, dh_v=dh_v,
                           d_q=d_q, d_kv=d_kv, qk_pad=qk_pad,
                           use_query_residual=False)
    logits = jnp.dot(out.astype(jnp.bfloat16), fw,
                     preferred_element_type=jnp.float32) + fb
    o_ref[0, 0] = logits


def decode_all(prep, queries_bf16, lat_kv_bf16):
    """queries: (VB, Nq, dq_pad) bf16 (views concatenated along batch),
       lat_kv:  (VB, n_lat, dkv_pad) bf16.  Returns (T, VB, Nq, fout_pad) f32."""
    ds = prep["dec_stack"]
    T = ds["T"]
    VB, Nq, dqp = queries_bf16.shape
    n_lat, dkvp = lat_kv_bf16.shape[1], lat_kv_bf16.shape[2]
    foutp = ds["fout_pad"]

    # query-row tiling (keeps VMEM bounded at realistic H*W query counts)
    tn = 512 if Nq >= 512 else _rup(Nq, 8)
    Nqp = _rup(Nq, tn)
    if Nqp != Nq:
        queries_bf16 = jnp.pad(queries_bf16, ((0, 0), (0, Nqp - Nq), (0, 0)))
    n_tiles = Nqp // tn

    w_args = [ds[k] for k in DEC_W_KEYS]

    in_specs = ([pl.BlockSpec((1, tn, dqp), lambda t, vb, n: (vb, n, 0)),
                 pl.BlockSpec((1, n_lat, dkvp), lambda t, vb, n: (vb, 0, 0))]
                + [_weight_spec(a.shape, lambda t, vb, n, _nd=a.ndim: (0,) * _nd)
                   for a in w_args])

    kernel = functools.partial(
        _decoder_kernel, num_heads=ds["num_heads"], d_q=ds["d_q"], d_kv=ds["d_kv"],
        dh_q=ds["qk"] // ds["num_heads"], dh_v=ds["vch"] // ds["num_heads"],
        qk_pad=ds["qk_pad"])

    out = pl.pallas_call(
        kernel,
        out_shape=jax.ShapeDtypeStruct((T, VB, Nqp, foutp), jnp.float32),
        grid=(T, VB, n_tiles),
        in_specs=in_specs,
        out_specs=pl.BlockSpec((1, 1, tn, foutp), lambda t, vb, n: (t, vb, n, 0)),
        compiler_params=pltpu.CompilerParams(
            dimension_semantics=("parallel", "parallel", "parallel")),
    )(queries_bf16, lat_kv_bf16, *w_args)
    return out[:, :, :Nq, :]


# ----------------------------------------------------------------------------- #
# Fourier positional encoding (concat_pos=True, sine_only=False) and camera rays
# ----------------------------------------------------------------------------- #
def fourier_size(num_bands, dims=3):
    return dims + 2 * dims * num_bands


def fourier_encode(pos, num_bands, max_resolution):
    # pos: (B, N, 3)
    freqs = jnp.stack([jnp.linspace(1.0, r / 2.0, num_bands, dtype=jnp.float32)
                       for r in max_resolution], axis=0)            # (3, nb)
    per = pos[..., :, None] * freqs[None, None]                     # (B, N, 3, nb)
    per = per.reshape(pos.shape[0], pos.shape[1], -1)
    return jnp.concatenate([pos, jnp.sin(jnp.pi * per), jnp.cos(jnp.pi * per)], axis=-1)


def camera_rays(intrinsics, pose, hw, downsample, to_world=True):
    """Origins and normalized world-frame view directions at downsampled resolution."""
    B = intrinsics.shape[0]
    h, w = hw[0] // downsample, hw[1] // downsample
    K = intrinsics * jnp.array([1.0 / downsample, 1.0 / downsample, 1.0],
                               dtype=jnp.float32)[None, :, None]
    fx, fy = K[:, 0, 0], K[:, 1, 1]
    cx, cy = K[:, 0, 2], K[:, 1, 2]
    ys, xs = jnp.meshgrid(jnp.arange(h, dtype=jnp.float32),
                          jnp.arange(w, dtype=jnp.float32), indexing="ij")
    # TODO(synk): vidar Camera may use a pixel-center (+0.5) convention; integer grid used.
    u = xs.reshape(-1)[None]
    v_ = ys.reshape(-1)[None]
    x_cam = (u - cx[:, None]) / fx[:, None]
    y_cam = (v_ - cy[:, None]) / fy[:, None]
    rays_cam = jnp.stack([x_cam, y_cam, jnp.ones_like(x_cam)], axis=-1)   # (B, HW, 3)
    R = pose[:, :3, :3]
    dirs = jnp.einsum("bij,bnj->bni", R, rays_cam) if to_world else rays_cam
    dirs = dirs / jnp.linalg.norm(dirs, axis=-1, keepdims=True)
    orig = jnp.broadcast_to(pose[:, None, :3, 3], (B, h * w, 3))
    return orig, dirs


# ----------------------------------------------------------------------------- #
# Decoder post-processing (sigmoid -> depth range, reshape, nearest upsample)
# ----------------------------------------------------------------------------- #
def _to_image(logits, shape, upsample):
    B, N, C = logits.shape
    h, w = shape[0] // upsample, shape[1] // upsample
    img = logits.reshape(B, h, w, C).transpose(0, 3, 1, 2)
    # TODO(synk): original uses convex/bilinear upsampling; nearest used here.
    return jnp.repeat(jnp.repeat(img, upsample, axis=2), upsample, axis=3)


def depth_postprocess(logits, shape, upsample, min_depth, max_depth):
    sig = jax.nn.sigmoid(logits)
    inv = 1.0 / max_depth + sig * (1.0 / min_depth - 1.0 / max_depth)
    depth = 1.0 / inv
    return _to_image(depth, shape, upsample)


# ----------------------------------------------------------------------------- #
# Parameter init (deterministic, synthetic) + padded/packed kernel preparation
# ----------------------------------------------------------------------------- #
def _normal(key, shape, std=0.02):
    return std * jax.random.normal(key, shape, dtype=jnp.float32)


def init_layer_params(key, q_dim, kv_dim, is_cross, widening=1):
    # HF default cross_attention_shape_for_attention == "kv"
    qk = kv_dim if is_cross else q_dim
    vch = qk
    hid = widening * q_dim
    ks = jax.random.split(key, 6)
    return {
        "ln1_g": jnp.ones((q_dim,), jnp.float32), "ln1_b": jnp.zeros((q_dim,), jnp.float32),
        "ln2_g": jnp.ones((kv_dim,), jnp.float32), "ln2_b": jnp.zeros((kv_dim,), jnp.float32),
        "q_w": _normal(ks[0], (q_dim, qk)), "q_b": jnp.zeros((qk,), jnp.float32),
        "k_w": _normal(ks[1], (kv_dim, qk)), "k_b": jnp.zeros((qk,), jnp.float32),
        "v_w": _normal(ks[2], (kv_dim, vch)), "v_b": jnp.zeros((vch,), jnp.float32),
        "o_w": _normal(ks[3], (vch, q_dim)), "o_b": jnp.zeros((q_dim,), jnp.float32),
        "ln_mlp_g": jnp.ones((q_dim,), jnp.float32), "ln_mlp_b": jnp.zeros((q_dim,), jnp.float32),
        "mlp1_w": _normal(ks[4], (q_dim, hid)), "mlp1_b": jnp.zeros((hid,), jnp.float32),
        "mlp2_w": _normal(ks[5], (hid, q_dim)), "mlp2_b": jnp.zeros((q_dim,), jnp.float32),
    }


@dataclass
class Config:
    tasks: tuple = ("rgb", "depth")
    to_world: bool = True
    depth_range: tuple = (0.1, 100.0)
    rgb_feat_dim: int = 8
    rgb_feat_type: str = "convnet"
    encoder_with_rgb: bool = True
    decoder_with_rgb: bool = False
    output_mode: str = "inv_depth"
    sample_encoding_rays: int = 0
    with_monodepth: bool = False
    upsample_convex: str = "nearest"
    downsample_encoder: int = 4
    downsample_decoder: int = 4
    image_shape: tuple = (16, 16)
    num_bands_orig: int = 4
    max_resolution_orig: int = 8
    num_bands_dirs: int = 4
    d_latents: int = 32
    num_latents: int = 16
    hidden_dropout_prob: float = 0.0
    num_cross_attention_heads: int = 1
    num_self_attends_per_block: int = 2
    num_self_attention_heads: int = 4
    decoder_num_heads: int = 1
    tot_encoder: int = field(init=False, default=0)
    tot_decoder: int = field(init=False, default=0)

    def __post_init__(self):
        fe = fourier_size(self.num_bands_orig) + fourier_size(self.num_bands_dirs)
        self.tot_encoder = fe + (self.rgb_feat_dim if self.encoder_with_rgb else 0)
        self.tot_decoder = fe + (self.rgb_feat_dim if self.decoder_with_rgb else 0)


def init_params(key, cfg):
    ks = jax.random.split(key, 8)
    return {
        "feature": {
            "conv_w": _normal(ks[0], (cfg.rgb_feat_dim, 3, 7, 7)),
            "conv_b": jnp.zeros((cfg.rgb_feat_dim,), jnp.float32),
            "bn_gamma": jnp.ones((cfg.rgb_feat_dim,), jnp.float32),
            "bn_beta": jnp.zeros((cfg.rgb_feat_dim,), jnp.float32),
            "bn_mean": jnp.zeros((cfg.rgb_feat_dim,), jnp.float32),
            "bn_var": jnp.ones((cfg.rgb_feat_dim,), jnp.float32),
        },
        "latents": _normal(ks[1], (cfg.num_latents, cfg.d_latents)),
        "enc_cross": init_layer_params(ks[2], cfg.d_latents, cfg.tot_encoder, is_cross=True),
        "self_layers": [init_layer_params(k, cfg.d_latents, cfg.d_latents, is_cross=False)
                        for k in jax.random.split(ks[3], cfg.num_self_attends_per_block)],
        "depth_decoder": {
            "cross": init_layer_params(ks[4], cfg.tot_decoder, cfg.d_latents, is_cross=True),
            "final_w": _normal(ks[5], (cfg.tot_decoder, 1)),
            "final_b": jnp.zeros((1,), jnp.float32),
        },
        "rgb_decoder": {
            "cross": init_layer_params(ks[6], cfg.tot_decoder, cfg.d_latents, is_cross=True),
            "final_w": _normal(ks[7], (cfg.tot_decoder, 3)),
            "final_b": jnp.zeros((3,), jnp.float32),
        },
    }


def prep_cross_params(lp, num_heads, final_w=None, final_b=None):
    """Zero-pad / pack cross-attention layer weights; attention scale folded into wq/bq."""
    d_q, qk = lp["q_w"].shape
    d_kv = lp["k_w"].shape[0]
    vch = lp["v_w"].shape[1]
    hid = lp["mlp1_w"].shape[1]
    dqp, dkvp, qkp, vp, hidp = (_rup(d) for d in (d_q, d_kv, qk, vch, hid))
    scale = 1.0 / math.sqrt(qk // num_heads)
    out = {
        "d_q": d_q, "d_kv": d_kv, "qk": qk, "vch": vch, "num_heads": num_heads,
        "dq_pad": dqp, "dkv_pad": dkvp, "qk_pad": qkp, "v_pad": vp,
        "ln1_g": _pad1(lp["ln1_g"], dqp).reshape(1, dqp),
        "ln1_b": _pad1(lp["ln1_b"], dqp).reshape(1, dqp),
        "ln2_g": _pad1(lp["ln2_g"], dkvp).reshape(1, dkvp),
        "ln2_b": _pad1(lp["ln2_b"], dkvp).reshape(1, dkvp),
        "wq": _pad2(lp["q_w"] * scale, dqp, qkp).astype(jnp.bfloat16),      # scale folded
        "bq": _pad1(lp["q_b"] * scale, qkp).reshape(1, qkp),
        "wkv": jnp.concatenate([_pad2(lp["k_w"], dkvp, qkp),
                                _pad2(lp["v_w"], dkvp, vp)], axis=1).astype(jnp.bfloat16),
        "bkv": jnp.concatenate([_pad1(lp["k_b"], qkp),
                                _pad1(lp["v_b"], vp)]).reshape(1, qkp + vp),
        "wo": _pad2(lp["o_w"], vp, dqp).astype(jnp.bfloat16),
        "bo": _pad1(lp["o_b"], dqp).reshape(1, dqp),
        "lnm_g": _pad1(lp["ln_mlp_g"], dqp).reshape(1, dqp),
        "lnm_b": _pad1(lp["ln_mlp_b"], dqp).reshape(1, dqp),
        "w1": _pad2(lp["mlp1_w"], dqp, hidp).astype(jnp.bfloat16),
        "b1": _pad1(lp["mlp1_b"], hidp).reshape(1, hidp),
        "w2": _pad2(lp["mlp2_w"], hidp, dqp).astype(jnp.bfloat16),
        "b2": _pad1(lp["mlp2_b"], dqp).reshape(1, dqp),
    }
    if final_w is not None:
        fout = final_w.shape[1]
        fop = _rup(fout)
        out.update(fout=fout, fout_pad=fop,
                   fw=_pad2(final_w, dqp, fop).astype(jnp.bfloat16),
                   fb=_pad1(final_b, fop).reshape(1, fop))
    return out


def prep_self_params(lp, num_heads):
    """Self-attention layer: single packed QKV projection, scale folded into the Q columns."""
    d_q, qk = lp["q_w"].shape
    vch = lp["v_w"].shape[1]
    hid = lp["mlp1_w"].shape[1]
    dqp, qkp, vp, hidp = (_rup(d) for d in (d_q, qk, vch, hid))
    scale = 1.0 / math.sqrt(qk // num_heads)
    return {
        "d_q": d_q, "qk": qk, "vch": vch, "num_heads": num_heads,
        "dq_pad": dqp, "qk_pad": qkp, "v_pad": vp,
        "ln1_g": _pad1(lp["ln1_g"], dqp).reshape(1, dqp),
        "ln1_b": _pad1(lp["ln1_b"], dqp).reshape(1, dqp),
        "wqkv": jnp.concatenate([_pad2(lp["q_w"] * scale, dqp, qkp),
                                 _pad2(lp["k_w"], dqp, qkp),
                                 _pad2(lp["v_w"], dqp, vp)], axis=1).astype(jnp.bfloat16),
        "bqkv": jnp.concatenate([_pad1(lp["q_b"] * scale, qkp),
                                 _pad1(lp["k_b"], qkp),
                                 _pad1(lp["v_b"], vp)]).reshape(1, 2 * qkp + vp),
        "wo": _pad2(lp["o_w"], vp, dqp).astype(jnp.bfloat16),
        "bo": _pad1(lp["o_b"], dqp).reshape(1, dqp),
        "lnm_g": _pad1(lp["ln_mlp_g"], dqp).reshape(1, dqp),
        "lnm_b": _pad1(lp["ln_mlp_b"], dqp).reshape(1, dqp),
        "w1": _pad2(lp["mlp1_w"], dqp, hidp).astype(jnp.bfloat16),
        "b1": _pad1(lp["mlp1_b"], hidp).reshape(1, hidp),
        "w2": _pad2(lp["mlp2_w"], hidp, dqp).astype(jnp.bfloat16),
        "b2": _pad1(lp["mlp2_b"], dqp).reshape(1, dqp),
    }


def stack_self_layers(self_preps):
    stacked = {k: jnp.stack([sp[k] for sp in self_preps], axis=0) for k in SELF_W_KEYS}
    for k in ("d_q", "qk", "vch", "num_heads", "dq_pad", "qk_pad", "v_pad"):
        stacked[k] = self_preps[0][k]
    stacked["num_layers"] = len(self_preps)
    return stacked


def stack_decoders(dec_preps, task_names):
    stacked = {k: jnp.stack([dp[k] for dp in dec_preps], axis=0) for k in DEC_W_KEYS}
    for k in ("d_q", "d_kv", "qk", "vch", "num_heads",
              "dq_pad", "dkv_pad", "qk_pad", "v_pad", "fout_pad"):
        stacked[k] = dec_preps[0][k]
    stacked["tasks"] = tuple(task_names)
    stacked["fouts"] = tuple(dp["fout"] for dp in dec_preps)
    stacked["T"] = len(dec_preps)
    return stacked


def prep_conv_params(fp):
    Cout = fp["conv_w"].shape[0]
    K = fp["conv_w"].shape[1] * 49
    Cp = _rup(Cout)
    scale = fp["bn_gamma"] / jnp.sqrt(fp["bn_var"] + 1e-5)
    shift = (fp["conv_b"] - fp["bn_mean"]) * scale + fp["bn_beta"]
    w = fp["conv_w"].reshape(Cout, K).T * scale[None, :]          # BN scale folded in
    return {"w": _pad2(w, K, Cp).astype(jnp.bfloat16),            # K not padded (full dim)
            "shift": _pad1(shift, Cp).reshape(1, Cp).astype(jnp.float32),
            "Cout": Cout, "K": K, "Cp": Cp}


def prepare_params(params, cfg):
    enc_cross = prep_cross_params(params["enc_cross"], cfg.num_cross_attention_heads)
    self_preps = [prep_self_params(lp, cfg.num_self_attention_heads)
                  for lp in params["self_layers"]]
    dec_tasks, dec_preps = [], []
    if "rgb" in cfg.tasks:
        dec_tasks.append("rgb")
        dec_preps.append(prep_cross_params(params["rgb_decoder"]["cross"],
                                           cfg.decoder_num_heads,
                                           params["rgb_decoder"]["final_w"],
                                           params["rgb_decoder"]["final_b"]))
    if "depth" in cfg.tasks:
        dec_tasks.append("depth")
        dec_preps.append(prep_cross_params(params["depth_decoder"]["cross"],
                                           cfg.decoder_num_heads,
                                           params["depth_decoder"]["final_w"],
                                           params["depth_decoder"]["final_b"]))
    return {
        "feature": prep_conv_params(params["feature"]),
        "latents_pad": _pad_last(params["latents"], enc_cross["dq_pad"]),
        "enc_cross": enc_cross,
        "self_stack": stack_self_layers(self_preps),
        "dec_stack": stack_decoders(dec_preps, dec_tasks),
    }


# ----------------------------------------------------------------------------- #
# DeFiNeNet forward (eval path: no ray subsampling, no monodepth branch)
# ----------------------------------------------------------------------------- #
def define_forward(prep, cfg, encode_data):
    hw = cfg.image_shape
    ds = cfg.downsample_encoder

    # --- embeddings(data, sources=['rgb','cam'], downsample_encoder) -------------
    b_sizes = [d["rgb"].shape[0] for d in encode_data]
    rgb_all = jnp.concatenate([d["rgb"] for d in encode_data], axis=0)
    feat_all = downsample_rgb(prep["feature"], rgb_all)              # (sumB, C, H/4, W/4)
    splits = list(itertools.accumulate(b_sizes))[:-1]
    feats = jnp.split(feat_all, splits, axis=0)
    # TODO(synk): with_monodepth (ResNet encoder/decoder pseudo-label branch) not implemented.

    embeddings = []
    for datum, feat in zip(encode_data, feats):
        orig, dirs = camera_rays(datum["intrinsics"], datum["pose"], hw, ds, cfg.to_world)
        orig_enc = fourier_encode(orig, cfg.num_bands_orig, [cfg.max_resolution_orig] * 3)
        dirs_enc = fourier_encode(dirs, cfg.num_bands_dirs, [cfg.num_bands_dirs] * 3)
        cam_enc = jnp.concatenate([orig_enc, dirs_enc], axis=-1)
        B, C, hh, ww = feat.shape
        rgb_flat = feat.reshape(B, C, hh * ww).transpose(0, 2, 1)
        embeddings.append({"cam": cam_enc, "rgb": rgb_flat,
                           "all": jnp.concatenate([cam_enc, rgb_flat], axis=-1)})

    encode_field = "all" if cfg.encoder_with_rgb else "cam"
    decode_field = "all" if cfg.decoder_with_rgb else "cam"

    # --- encode: cross-attention + all self-attends in ONE pallas_call -----------
    # TODO(synk): training-time sample_encoding_rays / sample_decoder subsampling not implemented.
    all_emb = jnp.concatenate([e[encode_field] for e in embeddings], axis=1)
    B = all_emb.shape[0]
    latent_pad = encode_latent(prep, cfg, all_emb)            # (B, num_latents, dq_pad) f32

    # --- decode: all views x task heads in ONE pallas_call -----------------------
    dec = prep["dec_stack"]
    n_views = len(embeddings)
    queries = jnp.concatenate([_pad_last(e[decode_field], dec["dq_pad"])
                               for e in embeddings], axis=0).astype(jnp.bfloat16)
    lat_for_dec = latent_pad[..., :dec["dkv_pad"]] if latent_pad.shape[-1] >= dec["dkv_pad"] \
        else _pad_last(latent_pad, dec["dkv_pad"])
    lat_kv = jnp.concatenate([lat_for_dec] * n_views, axis=0).astype(jnp.bfloat16)

    logits_all = decode_all(prep, queries, lat_kv)            # (T, n_views*B, Nq, fout_pad)

    output = {}
    for ti, task in enumerate(dec["tasks"]):
        fout = dec["fouts"][ti]
        outs = []
        for vi in range(n_views):
            lg = logits_all[ti, vi * B:(vi + 1) * B, :, :fout]
            if task == "rgb":
                outs.append(_to_image(lg, hw, cfg.downsample_decoder))
            else:
                outs.append(depth_postprocess(lg, hw, cfg.downsample_decoder,
                                              cfg.depth_range[0], cfg.depth_range[1]))
        output[task] = outs

    latent = latent_pad[..., :cfg.d_latents]
    return {"output": output,
            "encode_embeddings": embeddings,
            "decode_embeddings": embeddings,
            "latent": latent}


# ----------------------------------------------------------------------------- #
# Main
# ----------------------------------------------------------------------------- #
if __name__ == "__main__":
    cfg = Config()
    root = jax.random.PRNGKey(0)
    k_par, k_in = jax.random.split(root)
    params = init_params(k_par, cfg)
    prep = prepare_params(params, cfg)

    ks = jax.random.split(k_in, 2)

    def make_view(k, tx):
        rgb = jax.random.uniform(k, (2, 3, 16, 16), dtype=jnp.float32)
        intr = jnp.broadcast_to(
            jnp.array([[16.0, 0.0, 8.0], [0.0, 16.0, 8.0], [0.0, 0.0, 1.0]], jnp.float32),
            (2, 3, 3))
        pose = jnp.broadcast_to(jnp.eye(4, dtype=jnp.float32), (2, 4, 4))
        pose = pose.at[:, 0, 3].set(tx)
        return {"rgb": rgb, "intrinsics": intr, "pose": pose}

    encode_data = [make_view(ks[0], 0.0), make_view(ks[1], 0.5)]

    out = define_forward(prep, cfg, encode_data)
    out = jax.block_until_ready(out)

    assert out["latent"].shape == (2, cfg.num_latents, cfg.d_latents)
    assert out["output"]["depth"][0].shape == (2, 1, 16, 16)
    assert out["output"]["rgb"][0].shape == (2, 3, 16, 16)
    assert len(out["output"]["depth"]) == 2 and len(out["output"]["rgb"]) == 2
    assert bool(jnp.all(jnp.isfinite(out["latent"])))
    assert bool(jnp.all(jnp.isfinite(out["output"]["depth"][0])))
    assert bool(jnp.all(jnp.isfinite(out["output"]["rgb"][0])))
    print("KERNEL_OK")
</pallas_src>

<mosaic_0001>
module attributes {stable_mosaic.version = 11 : i64} {
  func.func @k(%arg0: i32, %arg1: memref<8x128xf32, #tpu.memory_space<vmem>>, %arg2: memref<8x128xf32, #tpu.memory_space<vmem>>, %arg3: memref<8x128xf32, #tpu.memory_space<vmem>>) attributes {dimension_semantics = [#tpu.dimension_semantics<arbitrary>], iteration_bounds = array<i64: 2>, scalar_prefetch = 0 : i64, scratch_operands = 0 : i64, tpu.core_type = #tpu.core_type<tc>, window_params = [{transform_indices = @transform_0, window_bounds = array<i64: 8, 128>}, {pipeline_mode = #tpu.pipeline_mode<synchronous>, transform_indices = @transform_1, window_bounds = array<i64: 8, 128>}, {transform_indices = @transform_2, window_bounds = array<i64: 8, 128>}]} {
    %c0 = arith.constant 0 : index
    %c0_0 = arith.constant 0 : index
    %0 = vector.load %arg1[%c0, %c0_0] : memref<8x128xf32, #tpu.memory_space<vmem>>, vector<8x128xf32>
    %c0_1 = arith.constant 0 : index
    %c0_2 = arith.constant 0 : index
    %1 = vector.load %arg2[%c0_1, %c0_2] : memref<8x128xf32, #tpu.memory_space<vmem>>, vector<8x128xf32>
    %2 = arith.addf %0, %1 : vector<8x128xf32>
    %c0_3 = arith.constant 0 : index
    %c0_4 = arith.constant 0 : index
    %3 = vector.load %arg3[%c0_3, %c0_4] : memref<8x128xf32, #tpu.memory_space<vmem>>, vector<8x128xf32>
    tpu.vector_store %arg3[%c0_3, %c0_4], %2 {strides = array<i32>} : memref<8x128xf32, #tpu.memory_space<vmem>>, vector<8x128xf32>,
    return
  }
  func.func @transform_0(%arg0: i32) -> (i32, i32) {
    %c0_i32 = arith.constant 0 : i32
    %c0_i32_0 = arith.constant 0 : i32
    return %arg0, %c0_i32 : i32, i32
  }
  func.func @transform_1(%arg0: i32) -> (i32, i32) {
    %c0_i32 = arith.constant 0 : i32
    %c0_i32_0 = arith.constant 0 : i32
    %c0_i32_1 = arith.constant 0 : i32
    return %c0_i32, %c0_i32_0 : i32, i32
  }
  func.func @transform_2(%arg0: i32) -> (i32, i32) {
    %c0_i32 = arith.constant 0 : i32
    %c0_i32_0 = arith.constant 0 : i32
    return %arg0, %c0_i32 : i32, i32
  }
}

module attributes {stable_mosaic.version = 11 : i64} {
  func.func @_conv_bn_relu_kernel(%arg0: i32, %arg1: memref<256x147xbf16, #tpu.memory_space<vmem>>, %arg2: memref<147x128xbf16, #tpu.memory_space<vmem>>, %arg3: memref<1x128xf32, #tpu.memory_space<vmem>>, %arg4: memref<256x128xf32, #tpu.memory_space<vmem>>) attributes {dimension_semantics = [#tpu.dimension_semantics<parallel>], iteration_bounds = array<i64: 1>, scalar_prefetch = 0 : i64, scratch_operands = 0 : i64, tpu.core_type = #tpu.core_type<tc>, window_params = [{transform_indices = @transform_0, window_bounds = array<i64: 256, 147>}, {pipeline_mode = #tpu.pipeline_mode<synchronous>, transform_indices = @transform_1, window_bounds = array<i64: 147, 128>}, {pipeline_mode = #tpu.pipeline_mode<synchronous>, transform_indices = @transform_2, window_bounds = array<i64: 1, 128>}, {transform_indices = @transform_3, window_bounds = array<i64: 256, 128>}]} {
    %c0 = arith.constant 0 : index
    %c0_0 = arith.constant 0 : index
    %0 = vector.load %arg1[%c0, %c0_0] : memref<256x147xbf16, #tpu.memory_space<vmem>>, vector<256x147xbf16>
    %c0_1 = arith.constant 0 : index
    %c0_2 = arith.constant 0 : index
    %1 = vector.load %arg2[%c0_1, %c0_2] : memref<147x128xbf16, #tpu.memory_space<vmem>>, vector<147x128xbf16>
    %cst = arith.constant dense<0.000000e+00> : vector<256x128xf32>
    %2 = tpu.matmul %0, %1, %cst {dimension_numbers = #tpu.dot_dimension_numbers<[1], [0], [0], [1], [0, 0, 1, 1], [], []>} : vector<256x147xbf16>, vector<147x128xbf16>, vector<256x128xf32> -> vector<256x128xf32>
    %c0_3 = arith.constant 0 : index
    %c0_4 = arith.constant 0 : index
    %3 = vector.load %arg3[%c0_3, %c0_4] : memref<1x128xf32, #tpu.memory_space<vmem>>, vector<1x128xf32>
    %4 = vector.broadcast %3 : vector<1x128xf32> to vector<256x128xf32>
    %5 = arith.addf %2, %4 : vector<256x128xf32>
    %cst_5 = arith.constant 0.000000e+00 : f32
    %6 = vector.broadcast %cst_5 : f32 to vector<256x128xf32>
    %7 = arith.maximumf %5, %6 : vector<256x128xf32>
    %c0_6 = arith.constant 0 : index
    %c0_7 = arith.constant 0 : index
    %8 = vector.load %arg4[%c0_6, %c0_7] : memref<256x128xf32, #tpu.memory_space<vmem>>, vector<256x128xf32>
    tpu.vector_store %arg4[%c0_6, %c0_7], %7 {strides = array<i32>} : memref<256x128xf32, #tpu.memory_space<vmem>>, vector<256x128xf32>,
    return
  }
  func.func @transform_0(%arg0: i32) -> (i32, i32) {
    %c0_i32 = arith.constant 0 : i32
    %c0_i32_0 = arith.constant 0 : i32
    return %arg0, %c0_i32 : i32, i32
  }
  func.func @transform_1(%arg0: i32) -> (i32, i32) {
    %c0_i32 = arith.constant 0 : i32
    %c0_i32_0 = arith.constant 0 : i32
    %c0_i32_1 = arith.constant 0 : i32
    return %c0_i32, %c0_i32_0 : i32, i32
  }
  func.func @transform_2(%arg0: i32) -> (i32, i32) {
    %c0_i32 = arith.constant 0 : i32
    %c0_i32_0 = arith.constant 0 : i32
    %c0_i32_1 = arith.constant 0 : i32
    return %c0_i32, %c0_i32_0 : i32, i32
  }
  func.func @transform_3(%arg0: i32) -> (i32, i32) {
    %c0_i32 = arith.constant 0 : i32
    %c0_i32_0 = arith.constant 0 : i32
    return %arg0, %c0_i32 : i32, i32
  }
}

</mosaic_0001>

<bundles_post_ra>
// kernel: tpu_custom_call.1
= control target key start
LH: loop header
LB: loop body
LE: loop exit
PB: predicated region body
PF: predicated region fallthrough
CT: control target
= control target key end

     0   :  { %7 = vsyncpa [#allocation3], 0  ;;  %s633_s0 = inlined_call_operand.hbm [shape: f32[16,128], index: 0, kind: input, shape index: {}]   ;;  %s634_s1 = inlined_call_operand.hbm [shape: f32[8,128], index: 1, kind: input, shape index: {}]   ;;  %s635_s2 = inlined_call_operand.hbm [shape: f32[16,128], index: 2, kind: output, shape index: {}]  }
   0x1   :  { %9 = vsyncpa [#allocation3 + $0x1], 0 }
   0x2   :  { %10 = vsyncpa [#allocation6], 0 }
   0x3   :  { %11 = vsyncpa [#allocation4], 0 }
   0x4   :  { %13 = vsyncpa [#allocation4 + $0x1], 0  ;;  %s495_s9 = smov 0   ;;  %s497_s10 = smov 0  }
   0x5   :  { %s499_s11 = smov 0   ;;  %s501_s12 = smov 0  }
   0x6 LB: > { %s516_s13 = sadd.s32 4294967295, %s477_s12   ;;  %s276_s14 = sadd.s32 4294967294, %s477_s12   ;;  %s477_s12 = sphi %s501_s12, %s645_s12   ;;  %s473_s11 = sphi %s499_s11, %s644_s11   ;;  %s469_s10 = sphi %s497_s10, %s643_s10   ;;  %s465_s9 = sphi %s495_s9, %s642_s9  }
   0x7   : > { %p39_p0 = scmp.ne.s32.totalorder %s469_s10, %s465_s9  ;;  %p40_p1 = scmp.eq.s32.totalorder %s516_s13, 0 }
   0x8   : > { %p84_p2 = scmp.eq.s32.totalorder %s516_s13, 1  ;;  %p90_p3 = scmp.eq.s32.totalorder %s276_s14, 1 }
   0x9   : > { %p525_p4 = por %p40_p1, %p39_p0  ;;  %p277_p5 = scmp.ge.s32.totalorder %s477_s12, 1 }
   0xa   : > { %p530_p6 = por %p90_p3, %p39_p0  ;;  %p97_p7 = scmp.lt.s32.totalorder %s477_s12, 3 }
   0xb   : > { %s109_s19 = sshll.u32 %s634_s1, 4  ;;  %s479_s21 = smov [#allocation5]   ;;  %s110_s19 = int_to_ptr.hbm [resolvable:$true] %s109_s19 }
   0xc   : > { %p538_p8 = pnand %p277_p5, %p97_p7  ;;  %s111_s22 = sshll.u32 %s479_s21, 4  ;;  %s112_s22 = int_to_ptr.vmem [resolvable:$true] %s111_s22 }
   0xd   : > { %s548_s23 = sadd.s32 1, %s477_s12   ;;  %s26_s24 = sadd.s32 1, %s473_s11 }
   0xe   : > { %p298_p10 = pneg %p538_p8  ;;  %s23_s25 = ssub.s32 %s477_s12, %s548_s23 }
   0xf   : > { %p24_p12 = scmp.eq.s32.totalorder %s23_s25, 0  ;;  %p33_p13 = scmp.ne.s32.totalorder %s473_s11, %s469_s10 }
  0x10   : > { %p299_p11 = pnand %p298_p10, %p40_p1  ;;  %p34_p0 = scmp.eq.s32.totalorder %s477_s12, 0 }
  0x11   : > { %s557_s26 = scalar_select %p24_p12, %s473_s11, %s26_s24  }
  0x12   : > { %301 = dma.hbm_to_vmem [thread:$0]  (!%p299_p11), %s110_s19, 128, %s112_s22, [#allocation6]  }
  0x13   : > { %p561_p3 = por %p84_p2, %p33_p13  ;;  %p311_p5 = scmp.lt.s32.totalorder %s477_s12, 2 }
  0x14   : > { %s122_s28 = sand.u32 1, %s473_s11   ;;  %s281_s29 = sshll.u32 %s477_s12, 3 }
  0x15   : > { %p35_p7 = por %p34_p0, %p33_p13  ;;  %s280_s30 = sshll.u32 %s122_s28, 3 }
  0x16   : > { %s130_s5 = scalar_lea.hbm %s633_s0, %s281_s29  ;;  %s126_s7 = scalar_lea.vmem [#allocation2], %s280_s30 }
  0x17   : > { %s132_s6 = sshll.u32 %s130_s5, 4  ;;  %s134_s8 = sshll.u32 %s126_s7, 4  ;;  %s133_s6 = int_to_ptr.hbm [resolvable:$true] %s132_s6  ;;  %s135_s8 = int_to_ptr.vmem [resolvable:$true] %s134_s8 }
  0x18   : > { %p571_p10 = pnand %p311_p5, %p35_p7  ;;  %s123_s17 = scalar_lea.sflag [#allocation3], %s122_s28 }
  0x19   : > { %s377_s18 = sshra.s32 %s133_s6, 4  ;;  %s384_s24 = scalar_lea.hbm %s633_s0, 16  ;;  %s378_s18 = int_to_ptr.hbm [resolvable:$true] %s377_s18 }
  0x1a   : > { %s379_s19 = scalar_lea.hbm %s378_s18, 8  ;;  %p381_p11 = pneg %p571_p10 }
  0x1b   : > { %p380_p2 = scmp.ne.s32.totalorder %s378_s18, %s379_s19  ;;  %p385_p0 = scmp.lt.s32.totalorder %s378_s18, %s633_s0 }
  0x1c   : > { %p386_p5 = scmp.lt.s32.totalorder %s384_s24, %s379_s19 }
  0x1d   : > { %p382_p12 = pnand %p381_p11, %p380_p2 }
  0x1e   : > { %p387_p7 = por %p386_p5, %p385_p0 }
  0x1f   : > { %p383_p13 = pneg %p382_p12 }
  0x21   : > { %p388_p9 = pnand %p387_p7, %p383_p13 }
  0x23   : > { %391 = shalt.err (!%p388_p9)
}
  0x24   : > { %305 = dma.hbm_to_vmem [thread:$0]  (!%p571_p10), %s133_s6, 128, %s135_s8, %s123_s17  }
  0x25   : > { %143 = sbr.rel (%p538_p8) target bundleno = 60 (0x3c), region = 28  ;;  %s588_s28 = sand.u32 (!%p538_p8), 1, %s469_s10  }
  0x26   : > { %s283_s30 = sshll.u32 (!%p538_p8), %s588_s28, 3  ;;  %s146_s3 = scalar_lea.sflag (!%p538_p8), [#allocation3], %s588_s28 }
  0x27   : > { %s149_s4 = scalar_lea.vmem (!%p538_p8), [#allocation2], %s283_s30 }
  0x2a   : > { %452 = dma.done.wait (%p525_p4), %s146_s3, 128  }
  0x2b   : > { %454 = vsyncadd (%p525_p4), %s146_s3, 4294967168 }
  0x2c   : > { %456 = dma.done.wait (%p40_p1), [#allocation6], 128  }
  0x2d   : > { %458 = vsyncadd (%p40_p1), [#allocation6], 4294967168  ;;  %s287_s20 = sshll.u32 %s516_s13, 3  ;;  %s175_s8 = scalar_lea.vmem [#allocation7], %s283_s30  ;;  %v176_v0 = vld [vmem:[%s149_s4] sm:$0xff]  ;;  %v177_v1 = vld [vmem:[#allocation5] sm:$0xff] }
  0x2e   : > { %s191_s7 = scalar_lea.hbm %s635_s2, %s287_s20  ;;  %s193_s14 = sshll.u32 %s175_s8, 4  ;;  %v178_v2 = vadd.f32 %v177_v1, %v176_v0  ;;  %s194_s14 = int_to_ptr.vmem [resolvable:$true] %s193_s14 }
  0x2f   : > { %s195_s17 = sshll.u32 %s191_s7, 4  ;;  %s181_s15 = scalar_lea.sflag [#allocation4], %s588_s28  ;;  %s196_s17 = int_to_ptr.hbm [resolvable:$true] %s195_s17 }
  0x30   : > { %179 = vst [vmem:[%s175_s8] sm:$0xff] %v178_v2  ;;  %s421_s18 = sshra.s32 %s196_s17, 4  ;;  %s427_s22 = scalar_lea.hbm %s635_s2, 16  ;;  %s422_s18 = int_to_ptr.hbm [resolvable:$true] %s421_s18 }
  0x31   : > { %s423_s19 = scalar_lea.hbm %s422_s18, 8  ;;  %p428_p9 = scmp.lt.s32.totalorder %s422_s18, %s635_s2 }
  0x32   : > { %p424_p1 = scmp.ne.s32.totalorder %s422_s18, %s423_s19  ;;  %p429_p10 = scmp.lt.s32.totalorder %s427_s22, %s423_s19 }
  0x34   : > { %p425_p4 = pnand %p424_p1, %p561_p3  ;;  %p430_p2 = por %p429_p10, %p428_p9 }
  0x36   : > { %p426_p8 = pneg %p425_p4 }
  0x38   : > { %p431_p11 = pnand %p430_p2, %p426_p8 }
  0x3a   : > { %434 = shalt.err (!%p431_p11)
}
  0x3b   : > { %296 = dma.vmem_to_hbm [thread:$0]  (%p561_p3), %s194_s14, 128, %s196_s17, %s181_s15  }
  0x3c PF: > { %s207_s29 = sand.u32 1, %s465_s9   ;;  %p641_p12 = scmp.ge.s32.totalorder %s477_s12, 2 }
  0x3d   : > { %s208_s28 = scalar_lea.sflag [#allocation4], %s207_s29 }
  0x3e   : > { %p307_p13 = pnand %p641_p12, %p530_p6 }
  0x40   : > { %p308_p0 = pneg %p307_p13 }
  0x42   : > { %460 = dma.done.wait (%p308_p0), %s208_s28, 128  }
  0x43   : > { %462 = vsyncadd (%p308_p0), %s208_s28, 4294967168  ;;  %p16_p5 = scmp.ge.s32.totalorder %s548_s23, 4   ;;  %s642_s9 = smov %s469_s10 }
  0x44   : > { %s643_s10 = smov %s473_s11  ;;  %s644_s11 = smov %s557_s26 }
  0x45   : > { %s645_s12 = smov %s548_s23  ;;  %18 = sbr.rel (!%p16_p5) target bundleno = 6 (0x6), region = 77 }
  0x4a   :  { %214 = vsyncpa [#allocation3], 1 }
  0x4b   :  { %216 = vsyncpa [#allocation3 + $0x1], 1 }
  0x4c   :  { %217 = vsyncpa [#allocation6], 1 }
  0x4d   :  { %218 = vsyncpa [#allocation4], 1 }
  0x4e   :  { %220 = vsyncpa [#allocation4 + $0x1], 1 }

// kernel: tpu_custom_call.1
= control target key start
LH: loop header
LB: loop body
LE: loop exit
PB: predicated region body
PF: predicated region fallthrough
CT: control target
= control target key end

     0   :  { %vm321_vm0 = vcmask 1040384   ;;  %vm322_vm1 = vcmask 1041408   ;;  %v850_v4 = vmov 65535   ;;  %s1158_s0 = inlined_call_operand.vmem [shape: bf16[256,147], index: 0, kind: input, shape index: {}]   ;;  %s1159_s1 = inlined_call_operand.vmem [shape: bf16[147,128], index: 1, kind: input, shape index: {}]   ;;  %s1160_s2 = inlined_call_operand.vmem [shape: f32[1,128], index: 2, kind: input, shape index: {}]   ;;  %s1161_s3 = inlined_call_operand.hbm [shape: f32[256,128], index: 3, kind: output, shape index: {}]  }
   0x1   :  { %v807_v0 = vld [vmem:[%s1159_s1 + $0x38] sm:$0xff]  ;;  %v66_v1 = vld [vmem:[%s1159_s1 + $0x48] sm:$0x3]  ;;  %v806_v3 = vld [vmem:[%s1159_s1 + $0x30] sm:$0xff]  ;;  %v323_v5 = vsel %vm321_vm0, 4294967295, %v850_v4 }
   0x2   :  { %v252_v2 = vunpack.c.l.b16 %v66_v1  ;;  %328 = vmatpush.bf16.msra.mxu0 %v807_v0  ;;  %809 = vmatpush.bf16.msra.mxu2 %v807_v0  ;;  %v324_v7 = vsel %vm322_vm1, %v323_v5, 0  ;;  %v805_v9 = vld [vmem:[%s1159_s1 + $0x28] sm:$0xff]  ;;  %v808_v10 = vld [vmem:[%s1159_s1 + $0x40] sm:$0xff] }
   0x3   :  { %v768_v11 = vld [vmem:[%s1158_s0 + $0x4] sm:$0xf]  ;;  %v592_v12 = vld [vmem:[%s1158_s0 + $0x8] sm:$0xf0] }
   0x4   :  { %v262_v6 = vpack.c.b16 %v252_v2, %v252_v2 }
   0x6   :  { %v326_v8 = vand.u32 %v324_v7, %v262_v6  ;;  %329 = vmatpush.bf16.msra.mxu0 %v806_v3  ;;  %810 = vmatpush.bf16.msra.mxu2 %v806_v3 }
   0x8   :  { %423 = vmatpush.bf16.msra.mxu1 %v326_v8  ;;  %817 = vmatpush.bf16.msra.mxu3 %v326_v8 }
   0x9   :  { %8 = vsyncpa [#allocation3], 0  ;;  %v786_v13 = vld [vmem:[%s1158_s0 + $0x94] sm:$0xf]  ;;  %v664_v14 = vld [vmem:[%s1158_s0 + $0x98] sm:$0xf0]  ;;  %v595_v15 = vor.u32 %v768_v11, %v592_v12 }
   0xa   :  { %330 = vmatpush.bf16.msra.mxu0 %v805_v9  ;;  %811 = vmatpush.bf16.msra.mxu2 %v805_v9  ;;  %v804_v16 = vld [vmem:[%s1159_s1 + $0x20] sm:$0xff]  ;;  %vm272_vm2 = vcmask 154624   ;;  %v667_v17 = vor.u32 %v786_v13, %v664_v14  ;;  %v803_v18 = vld [vmem:[%s1159_s1 + $0x18] sm:$0xff]  ;;  %v802_v19 = vld [vmem:[%s1159_s1 + $0x10] sm:$0xff]  ;;  %s576_s25 = sshll.u32 %s1161_s3, 4  ;;  %s852_s26 = smov 128   ;;  %s577_s25 = int_to_ptr.hbm [resolvable:$true] %s576_s25 }
   0xb   :  { %v801_v20 = vld [vmem:[%s1159_s1 + $0x8] sm:$0xff]  ;;  %v770_v21 = vld [vmem:[%s1158_s0 + $0x14] sm:$0xf]  ;;  %v600_v22 = vld [vmem:[%s1158_s0 + $0x18] sm:$0xf0]  ;;  %s853_s27 = smov 8  }
   0xc   :  { %424 = vmatpush.bf16.msra.mxu1 %v808_v10  ;;  %818 = vmatpush.bf16.msra.mxu3 %v808_v10  ;;  %v788_v23 = vld [vmem:[%s1158_s0 + $0xa4] sm:$0xf]  ;;  %v672_v24 = vld [vmem:[%s1158_s0 + $0xa8] sm:$0xf0]  ;;  %v603_v25 = vor.u32 %v770_v21, %v600_v22  ;;  %v590_v27 = vld [vmem:[%s1158_s0] sm:$0xf] }
   0xd   :  { %v800_v26 = vld [vmem:[%s1159_s1] sm:$0xff]  ;;  %v769_v28 = vld [vmem:[%s1158_s0 + $0x4] sm:$0xf0]  ;;  %v675_v31 = vor.u32 %v788_v23, %v672_v24  ;;  %v608_v35 = vld [vmem:[%s1158_s0 + $0x28] sm:$0xf0] }
   0xe   :  { %331 = vmatpush.bf16.msra.mxu0 %v804_v16  ;;  %812 = vmatpush.bf16.msra.mxu2 %v804_v16  ;;  %v654_v29 = vld [vmem:[%s1158_s0 + $0x80] sm:$0xf]  ;;  %v785_v30 = vld [vmem:[%s1158_s0 + $0x84] sm:$0xf0]  ;;  %v591_v32 = vor.u32 %v769_v28, %v590_v27  ;;  %v772_v34 = vld [vmem:[%s1158_s0 + $0x24] sm:$0xf] }
   0xf   :  { %752 = vmatmul.msk.bf16.vlgmr.msra.gmra.mxu1 %vm272_vm2, %v595_v15  ;;  %761 = vmatmul.msk.bf16.vlgmr.msra.gmra.mxu3 %vm272_vm2, %v667_v17  ;;  %v655_v33 = vor.u32 %v785_v30, %v654_v29  ;;  %v790_v36 = vld [vmem:[%s1158_s0 + $0xb4] sm:$0xf]  ;;  %v680_v37 = vld [vmem:[%s1158_s0 + $0xb8] sm:$0xf0]  ;;  %v611_v38 = vor.u32 %v772_v34, %v608_v35  ;;  %v598_v39 = vld [vmem:[%s1158_s0 + $0x10] sm:$0xf] }
  0x10   :  { %v771_v40 = vld [vmem:[%s1158_s0 + $0x14] sm:$0xf0]  ;;  %v662_v41 = vld [vmem:[%s1158_s0 + $0x90] sm:$0xf]  ;;  %v683_v43 = vor.u32 %v790_v36, %v680_v37  ;;  %v774_v46 = vld [vmem:[%s1158_s0 + $0x34] sm:$0xf] }
  0x11   :  { %v787_v42 = vld [vmem:[%s1158_s0 + $0x94] sm:$0xf0]  ;;  %v599_v44 = vor.u32 %v771_v40, %v598_v39  ;;  %v616_v47 = vld [vmem:[%s1158_s0 + $0x38] sm:$0xf0]  ;;  %v792_v48 = vld [vmem:[%s1158_s0 + $0xc4] sm:$0xf] }
  0x12   :  { %332 = vmatpush.bf16.msra.mxu0 %v803_v18  ;;  %813 = vmatpush.bf16.msra.mxu2 %v803_v18  ;;  %v663_v45 = vor.u32 %v787_v42, %v662_v41  ;;  %v688_v49 = vld [vmem:[%s1158_s0 + $0xc8] sm:$0xf0]  ;;  %v619_v50 = vor.u32 %v774_v46, %v616_v47  ;;  %v606_v51 = vld [vmem:[%s1158_s0 + $0x20] sm:$0xf]  ;;  %v773_v52 = vld [vmem:[%s1158_s0 + $0x24] sm:$0xf0] }
  0x13   :  { %v670_v53 = vld [vmem:[%s1158_s0 + $0xa0] sm:$0xf]  ;;  %v789_v54 = vld [vmem:[%s1158_s0 + $0xa4] sm:$0xf0]  ;;  %v691_v55 = vor.u32 %v792_v48, %v688_v49  ;;  %v607_v56 = vor.u32 %v773_v52, %v606_v51  ;;  %v776_v58 = vld [vmem:[%s1158_s0 + $0x44] sm:$0xf] }
  0x14   :  { %v671_v57 = vor.u32 %v789_v54, %v670_v53  ;;  %v624_v59 = vld [vmem:[%s1158_s0 + $0x48] sm:$0xf0]  ;;  %v794_v60 = vld [vmem:[%s1158_s0 + $0xd4] sm:$0xf]  ;;  %v696_v61 = vld [vmem:[%s1158_s0 + $0xd8] sm:$0xf0] }
  0x15   :  { %v627_v62 = vor.u32 %v776_v58, %v624_v59  ;;  %v614_v63 = vld [vmem:[%s1158_s0 + $0x30] sm:$0xf]  ;;  %v775_v0 = vld [vmem:[%s1158_s0 + $0x34] sm:$0xf0]  ;;  %v699_v3 = vor.u32 %v794_v60, %v696_v61  ;;  %v778_v6 = vld [vmem:[%s1158_s0 + $0x54] sm:$0xf] }
  0x16   :  { %333 = vmatpush.bf16.msra.mxu0 %v802_v19  ;;  %814 = vmatpush.bf16.msra.mxu2 %v802_v19  ;;  %v678_v1 = vld [vmem:[%s1158_s0 + $0xb0] sm:$0xf]  ;;  %v791_v2 = vld [vmem:[%s1158_s0 + $0xb4] sm:$0xf0]  ;;  %v615_v4 = vor.u32 %v775_v0, %v614_v63  ;;  %v632_v7 = vld [vmem:[%s1158_s0 + $0x58] sm:$0xf0] }
  0x17   :  { %v679_v5 = vor.u32 %v791_v2, %v678_v1  ;;  %v796_v8 = vld [vmem:[%s1158_s0 + $0xe4] sm:$0xf]  ;;  %v704_v9 = vld [vmem:[%s1158_s0 + $0xe8] sm:$0xf0]  ;;  %v635_v10 = vor.u32 %v778_v6, %v632_v7  ;;  %v622_v11 = vld [vmem:[%s1158_s0 + $0x40] sm:$0xf] }
  0x18   :  { %v777_v12 = vld [vmem:[%s1158_s0 + $0x44] sm:$0xf0]  ;;  %v686_v13 = vld [vmem:[%s1158_s0 + $0xc0] sm:$0xf]  ;;  %v707_v15 = vor.u32 %v796_v8, %v704_v9  ;;  %v780_v18 = vld [vmem:[%s1158_s0 + $0x64] sm:$0xf] }
  0x19   :  { %v793_v14 = vld [vmem:[%s1158_s0 + $0xc4] sm:$0xf0]  ;;  %v623_v16 = vor.u32 %v777_v12, %v622_v11  ;;  %v640_v19 = vld [vmem:[%s1158_s0 + $0x68] sm:$0xf0]  ;;  %v712_v21 = vld [vmem:[%s1158_s0 + $0xf8] sm:$0xf0] }
  0x1a   :  { %334 = vmatpush.bf16.msra.mxu0 %v801_v20  ;;  %815 = vmatpush.bf16.msra.mxu2 %v801_v20  ;;  %v687_v17 = vor.u32 %v793_v14, %v686_v13  ;;  %v798_v20 = vld [vmem:[%s1158_s0 + $0xf4] sm:$0xf]  ;;  %v643_v22 = vor.u32 %v780_v18, %v640_v19  ;;  %v630_v23 = vld [vmem:[%s1158_s0 + $0x50] sm:$0xf]  ;;  %v779_v24 = vld [vmem:[%s1158_s0 + $0x54] sm:$0xf0] }
  0x1b   :  { %v715_v27 = vor.u32 %v798_v20, %v712_v21  ;;  %v631_v28 = vor.u32 %v779_v24, %v630_v23  ;;  %v782_v30 = vld [vmem:[%s1158_s0 + $0x74] sm:$0xf]  ;;  %v781_v34 = vld [vmem:[%s1158_s0 + $0x64] sm:$0xf0]  ;;  %v702_v35 = vld [vmem:[%s1158_s0 + $0xe0] sm:$0xf] }
  0x1c   :  { %v797_v36 = vld [vmem:[%s1158_s0 + $0xe4] sm:$0xf0]  ;;  %v784_v39 = vld [vmem:[%s1158_s0 + $0x84] sm:$0xf]  ;;  %v656_v40 = vld [vmem:[%s1158_s0 + $0x88] sm:$0xf0] }
  0x1d   :  { %v659_v41 = vor.u32 %v784_v39, %v656_v40  ;;  %v646_v42 = vld [vmem:[%s1158_s0 + $0x70] sm:$0xf]  ;;  %v799_v46 = vld [vmem:[%s1158_s0 + $0xf4] sm:$0xf0]  ;;  %v1115_v51 = vld [vmem:[%s1160_s2] ss:$0 sm:$0xff] }
  0x1e   :  { %335 = vmatpush.bf16.msra.mxu0 %v800_v26  ;;  %816 = vmatpush.bf16.msra.mxu2 %v800_v26  ;;  %v795_v26 = vld [vmem:[%s1158_s0 + $0xd4] sm:$0xf0] }
  0x1f   :  { %753 = vmatmul.msk.bf16.gmra.mxu1 %vm272_vm2, %v603_v25  ;;  %762 = vmatmul.msk.bf16.gmra.mxu3 %vm272_vm2, %v675_v31  ;;  %v694_v25 = vld [vmem:[%s1158_s0 + $0xd0] sm:$0xf]  ;;  %v648_v31 = vld [vmem:[%s1158_s0 + $0x78] sm:$0xf0] }
  0x20   :  { %v695_v29 = vor.u32 %v795_v26, %v694_v25 }
  0x21   :  { %336 = vmatmul.bf16.vlgmr.msra.gmra.mxu0 %v591_v32  ;;  %376 = vmatmul.bf16.vlgmr.msra.gmra.mxu2 %v655_v33  ;;  %v651_v32 = vor.u32 %v782_v30, %v648_v31  ;;  %v638_v33 = vld [vmem:[%s1158_s0 + $0x60] sm:$0xf] }
  0x22   :  { %v639_v37 = vor.u32 %v781_v34, %v638_v33 }
  0x2f   :  { %754 = vmatmul.msk.bf16.gmra.mxu1 %vm272_vm2, %v611_v38  ;;  %763 = vmatmul.msk.bf16.gmra.mxu3 %vm272_vm2, %v683_v43  ;;  %v703_v38 = vor.u32 %v797_v36, %v702_v35  ;;  %v783_v43 = vld [vmem:[%s1158_s0 + $0x74] sm:$0xf0] }
  0x30   :  { %v647_v47 = vor.u32 %v783_v43, %v646_v42 }
  0x31   :  { %341 = vmatmul.bf16.gmra.mxu0 %v599_v44  ;;  %381 = vmatmul.bf16.gmra.mxu2 %v663_v45  ;;  %v710_v45 = vld [vmem:[%s1158_s0 + $0xf0] sm:$0xf]  ;;  %s851_s0 = smov [#allocation2]  }
  0x32   :  { %v711_v48 = vor.u32 %v799_v46, %v710_v45  ;;  %s574_s2 = sshll.u32 %s851_s0, 4  ;;  %s575_s2 = int_to_ptr.vmem [resolvable:$true] %s574_s2 }
  0x3f   :  { %755 = vmatmul.msk.bf16.gmra.mxu1 %vm272_vm2, %v619_v50  ;;  %764 = vmatmul.msk.bf16.gmra.mxu3 %vm272_vm2, %v691_v55 }
  0x41   :  { %346 = vmatmul.bf16.gmra.mxu0 %v607_v56  ;;  %386 = vmatmul.bf16.gmra.mxu2 %v671_v57 }
  0x4f   :  { %756 = vmatmul.msk.bf16.gmra.mxu1 %vm272_vm2, %v627_v62  ;;  %765 = vmatmul.msk.bf16.gmra.mxu3 %vm272_vm2, %v699_v3 }
  0x51   :  { %351 = vmatmul.bf16.gmra.mxu0 %v615_v4  ;;  %391 = vmatmul.bf16.gmra.mxu2 %v679_v5 }
  0x5f   :  { %757 = vmatmul.msk.bf16.gmra.mxu1 %vm272_vm2, %v635_v10  ;;  %766 = vmatmul.msk.bf16.gmra.mxu3 %vm272_vm2, %v707_v15 }
  0x61   :  { %356 = vmatmul.bf16.gmra.mxu0 %v623_v16  ;;  %396 = vmatmul.bf16.gmra.mxu2 %v687_v17 }
  0x6f   :  { %758 = vmatmul.msk.bf16.gmra.mxu1 %vm272_vm2, %v643_v22  ;;  %767 = vmatmul.msk.bf16.gmra.mxu3 %vm272_vm2, %v715_v27 }
  0x71   :  { %361 = vmatmul.bf16.gmra.mxu0 %v631_v28  ;;  %401 = vmatmul.bf16.gmra.mxu2 %v695_v29 }
  0x7f   :  { %759 = vmatmul.msk.bf16.gmra.mxu1 %vm272_vm2, %v651_v32 }
  0x81   :  { %366 = vmatmul.bf16.gmra.mxu0 %v639_v37  ;;  %406 = vmatmul.bf16.gmra.mxu2 %v703_v38 }
  0x8c   :  { %v426_v44 = vpop.f32.mrf.mxu1 }
  0x8f   :  { %760 = vmatmul.msk.bf16.gmra.mxu1 %vm272_vm2, %v659_v41 }
  0x91   :  { %371 = vmatmul.bf16.gmra.mxu0 %v647_v47  ;;  %411 = vmatmul.bf16.gmra.mxu2 %v711_v48 }
  0x92   :  { %v471_v52 = vpop.f32.mrf.mxu3 }
  0x94   :  { %v428_v49 = vpop.f32.mrf.mxu1 }
  0x9a   :  { %v473_v61 = vpop.f32.mrf.mxu3 }
  0x9c   :  { %v431_v50 = vpop.f32.mrf.mxu1 }
  0x9e   :  { %v337_v53 = vpop.f32.mrf.mxu0 }
  0x9f   :  { %v338_v54 = vadd.f32 %v1115_v51, %v337_v53 }
  0xa1   :  { %v427_v55 = vadd.f32 %v426_v44, %v338_v54 }
  0xa2   :  { %v476_v5 = vpop.f32.mrf.mxu3 }
  0xa3   :  { %v506_v56 = vmax.f32 %v427_v55, 0.0 }
  0xa4   :  { %v433_v57 = vpop.f32.mrf.mxu1  ;;  %v1118_v58 = vpop.f32.mrf.mxu2 }
  0xa5   :  { %538 = vst [vmem:[#allocation2] sm:$0xff] %v506_v56 }
  0xa6   :  { %v339_v59 = vpop.f32.mrf.mxu0 }
  0xa7   :  { %v340_v60 = vadd.f32 %v1115_v51, %v339_v59 }
  0xa9   :  { %v429_v62 = vadd.f32 %v428_v49, %v340_v60 }
  0xaa   :  { %v478_v17 = vpop.f32.mrf.mxu3 }
  0xab   :  { %v507_v63 = vmax.f32 %v429_v62, 0.0 }
  0xac   :  { %v436_v0 = vpop.f32.mrf.mxu1  ;;  %v1121_v1 = vpop.f32.mrf.mxu2 }
  0xad   :  { %539 = vst [vmem:[#allocation2 + $0x8] sm:$0xff] %v507_v63 }
  0xae   :  { %v342_v2 = vpop.f32.mrf.mxu0 }
  0xaf   :  { %v343_v3 = vadd.f32 %v1115_v51, %v342_v2 }
  0xb1   :  { %v432_v4 = vadd.f32 %v431_v50, %v343_v3 }
  0xb2   :  { %v481_v28 = vpop.f32.mrf.mxu3 }
  0xb3   :  { %v508_v6 = vmax.f32 %v432_v4, 0.0 }
  0xb4   :  { %v438_v7 = vpop.f32.mrf.mxu1  ;;  %v382_v8 = vpop.f32.mrf.mxu2 }
  0xb5   :  { %540 = vst [vmem:[#allocation2 + $0x10] sm:$0xff] %v508_v6  ;;  %v383_v9 = vadd.f32 %v1115_v51, %v382_v8 }
  0xb6   :  { %v344_v10 = vpop.f32.mrf.mxu0 }
  0xb7   :  { %v345_v11 = vadd.f32 %v1115_v51, %v344_v10  ;;  %v472_v12 = vadd.f32 %v471_v52, %v383_v9 }
  0xb9   :  { %v434_v13 = vadd.f32 %v433_v57, %v345_v11  ;;  %v524_v14 = vmax.f32 %v472_v12, 0.0 }
  0xba   :  { %v483_v41 = vpop.f32.mrf.mxu3 }
  0xbb   :  { %v509_v15 = vmax.f32 %v434_v13, 0.0  ;;  %556 = vst [vmem:[#allocation2 + $0x90] sm:$0xff] %v524_v14 }
  0xbc   :  { %v441_v16 = vpop.f32.mrf.mxu1  ;;  %v384_v18 = vpop.f32.mrf.mxu2 }
  0xbd   :  { %541 = vst [vmem:[#allocation2 + $0x18] sm:$0xff] %v509_v15  ;;  %v385_v19 = vadd.f32 %v1115_v51, %v384_v18 }
  0xbe   :  { %v347_v20 = vpop.f32.mrf.mxu0 }
  0xbf   :  { %v348_v21 = vadd.f32 %v1115_v51, %v347_v20  ;;  %v474_v22 = vadd.f32 %v473_v61, %v385_v19 }
  0xc1   :  { %v437_v23 = vadd.f32 %v436_v0, %v348_v21  ;;  %v525_v24 = vmax.f32 %v474_v22, 0.0 }
  0xc2   :  { %v486_v54 = vpop.f32.mrf.mxu3 }
  0xc3   :  { %v510_v25 = vmax.f32 %v437_v23, 0.0  ;;  %557 = vst [vmem:[#allocation2 + $0x98] sm:$0xff] %v525_v24 }
  0xc4   :  { %v443_v26 = vpop.f32.mrf.mxu1  ;;  %v387_v27 = vpop.f32.mrf.mxu2 }
  0xc5   :  { %542 = vst [vmem:[#allocation2 + $0x20] sm:$0xff] %v510_v25  ;;  %v388_v29 = vadd.f32 %v1115_v51, %v387_v27 }
  0xc6   :  { %v349_v30 = vpop.f32.mrf.mxu0 }
  0xc7   :  { %v350_v31 = vadd.f32 %v1115_v51, %v349_v30  ;;  %v477_v32 = vadd.f32 %v476_v5, %v388_v29 }
  0xc9   :  { %v439_v33 = vadd.f32 %v438_v7, %v350_v31  ;;  %v526_v34 = vmax.f32 %v477_v32, 0.0 }
  0xca   :  { %v488_v5 = vpop.f32.mrf.mxu3 }
  0xcb   :  { %v511_v35 = vmax.f32 %v439_v33, 0.0  ;;  %558 = vst [vmem:[#allocation2 + $0xa0] sm:$0xff] %v526_v34 }
  0xcc   :  { %v446_v36 = vpop.f32.mrf.mxu1  ;;  %v389_v37 = vpop.f32.mrf.mxu2 }
  0xcd   :  { %543 = vst [vmem:[#allocation2 + $0x28] sm:$0xff] %v511_v35  ;;  %v390_v38 = vadd.f32 %v1115_v51, %v389_v37 }
  0xce   :  { %v352_v39 = vpop.f32.mrf.mxu0 }
  0xcf   :  { %v353_v40 = vadd.f32 %v1115_v51, %v352_v39  ;;  %v479_v42 = vadd.f32 %v478_v17, %v390_v38 }
  0xd1   :  { %v442_v43 = vadd.f32 %v441_v16, %v353_v40  ;;  %v527_v44 = vmax.f32 %v479_v42, 0.0 }
  0xd2   :  { %v491_v16 = vpop.f32.mrf.mxu3 }
  0xd3   :  { %v512_v45 = vmax.f32 %v442_v43, 0.0  ;;  %559 = vst [vmem:[#allocation2 + $0xa8] sm:$0xff] %v527_v44 }
  0xd4   :  { %v448_v46 = vpop.f32.mrf.mxu1  ;;  %v392_v47 = vpop.f32.mrf.mxu2 }
  0xd5   :  { %544 = vst [vmem:[#allocation2 + $0x30] sm:$0xff] %v512_v45  ;;  %v393_v48 = vadd.f32 %v1115_v51, %v392_v47 }
  0xd6   :  { %v354_v49 = vpop.f32.mrf.mxu0 }
  0xd7   :  { %v355_v50 = vadd.f32 %v1115_v51, %v354_v49  ;;  %v482_v52 = vadd.f32 %v481_v28, %v393_v48 }
  0xd9   :  { %v444_v53 = vadd.f32 %v443_v26, %v355_v50  ;;  %v528_v55 = vmax.f32 %v482_v52, 0.0  ;;  %v378_v52 = vadd.f32 %v1115_v51, %v1118_v58  ;;  %v380_v58 = vadd.f32 %v1115_v51, %v1121_v1 }
  0xda   :  { %v493_v29 = vpop.f32.mrf.mxu3 }
  0xdb   :  { %v513_v56 = vmax.f32 %v444_v53, 0.0  ;;  %560 = vst [vmem:[#allocation2 + $0xb0] sm:$0xff] %v528_v55 }
  0xdc   :  { %v451_v57 = vpop.f32.mrf.mxu1  ;;  %v394_v59 = vpop.f32.mrf.mxu2 }
  0xdd   :  { %545 = vst [vmem:[#allocation2 + $0x38] sm:$0xff] %v513_v56  ;;  %v395_v60 = vadd.f32 %v1115_v51, %v394_v59 }
  0xde   :  { %v357_v61 = vpop.f32.mrf.mxu0 }
  0xdf   :  { %v358_v62 = vadd.f32 %v1115_v51, %v357_v61  ;;  %v484_v63 = vadd.f32 %v483_v41, %v395_v60 }
  0xe1   :  { %v447_v0 = vadd.f32 %v446_v36, %v358_v62  ;;  %v529_v2 = vmax.f32 %v484_v63, 0.0 }
  0xe2   :  { %v496_v41 = vpop.f32.mrf.mxu3 }
  0xe3   :  { %v514_v3 = vmax.f32 %v447_v0, 0.0  ;;  %561 = vst [vmem:[#allocation2 + $0xb8] sm:$0xff] %v529_v2 }
  0xe4   :  { %v453_v4 = vpop.f32.mrf.mxu1  ;;  %v397_v6 = vpop.f32.mrf.mxu2 }
  0xe5   :  { %546 = vst [vmem:[#allocation2 + $0x40] sm:$0xff] %v514_v3  ;;  %v398_v7 = vadd.f32 %v1115_v51, %v397_v6 }
  0xe6   :  { %v359_v8 = vpop.f32.mrf.mxu0 }
  0xe7   :  { %v360_v9 = vadd.f32 %v1115_v51, %v359_v8  ;;  %v487_v10 = vadd.f32 %v486_v54, %v398_v7 }
  0xe9   :  { %v449_v11 = vadd.f32 %v448_v46, %v360_v9  ;;  %v530_v12 = vmax.f32 %v487_v10, 0.0 }
  0xea   :  { %v498_v55 = vpop.f32.mrf.mxu3 }
  0xeb   :  { %v515_v13 = vmax.f32 %v449_v11, 0.0  ;;  %562 = vst [vmem:[#allocation2 + $0xc0] sm:$0xff] %v530_v12 }
  0xec   :  { %v456_v14 = vpop.f32.mrf.mxu1  ;;  %v399_v15 = vpop.f32.mrf.mxu2 }
  0xed   :  { %547 = vst [vmem:[#allocation2 + $0x48] sm:$0xff] %v515_v13  ;;  %v400_v17 = vadd.f32 %v1115_v51, %v399_v15 }
  0xee   :  { %v362_v18 = vpop.f32.mrf.mxu0 }
  0xef   :  { %v363_v19 = vadd.f32 %v1115_v51, %v362_v18  ;;  %v489_v20 = vadd.f32 %v488_v5, %v400_v17 }
  0xf1   :  { %v452_v21 = vadd.f32 %v451_v57, %v363_v19  ;;  %v531_v22 = vmax.f32 %v489_v20, 0.0 }
  0xf2   :  { %v501_v7 = vpop.f32.mrf.mxu3 }
  0xf3   :  { %v516_v23 = vmax.f32 %v452_v21, 0.0  ;;  %563 = vst [vmem:[#allocation2 + $0xc8] sm:$0xff] %v531_v22 }
  0xf4   :  { %v458_v24 = vpop.f32.mrf.mxu1  ;;  %v402_v25 = vpop.f32.mrf.mxu2 }
  0xf5   :  { %548 = vst [vmem:[#allocation2 + $0x50] sm:$0xff] %v516_v23  ;;  %v403_v26 = vadd.f32 %v1115_v51, %v402_v25 }
  0xf6   :  { %v364_v27 = vpop.f32.mrf.mxu0 }
  0xf7   :  { %v365_v28 = vadd.f32 %v1115_v51, %v364_v27  ;;  %v492_v30 = vadd.f32 %v491_v16, %v403_v26 }
  0xf9   :  { %v454_v31 = vadd.f32 %v453_v4, %v365_v28  ;;  %v532_v32 = vmax.f32 %v492_v30, 0.0 }
  0xfa   :  { %v503_v18 = vpop.f32.mrf.mxu3 }
  0xfb   :  { %v517_v33 = vmax.f32 %v454_v31, 0.0  ;;  %564 = vst [vmem:[#allocation2 + $0xd0] sm:$0xff] %v532_v32 }
  0xfc   :  { %v461_v34 = vpop.f32.mrf.mxu1  ;;  %v404_v35 = vpop.f32.mrf.mxu2 }
  0xfd   :  { %549 = vst [vmem:[#allocation2 + $0x58] sm:$0xff] %v517_v33  ;;  %v405_v36 = vadd.f32 %v1115_v51, %v404_v35 }
  0xfe   :  { %v367_v37 = vpop.f32.mrf.mxu0 }
  0xff   :  { %v368_v38 = vadd.f32 %v1115_v51, %v367_v37  ;;  %v494_v39 = vadd.f32 %v493_v29, %v405_v36 }
 0x101   :  { %v457_v40 = vadd.f32 %v456_v14, %v368_v38  ;;  %v533_v42 = vmax.f32 %v494_v39, 0.0 }
 0x103   :  { %v518_v43 = vmax.f32 %v457_v40, 0.0  ;;  %565 = vst [vmem:[#allocation2 + $0xd8] sm:$0xff] %v533_v42 }
 0x104   :  { %v463_v44 = vpop.f32.mrf.mxu1  ;;  %v407_v45 = vpop.f32.mrf.mxu2 }
 0x105   :  { %550 = vst [vmem:[#allocation2 + $0x60] sm:$0xff] %v518_v43  ;;  %v408_v46 = vadd.f32 %v1115_v51, %v407_v45 }
 0x106   :  { %v369_v47 = vpop.f32.mrf.mxu0 }
 0x107   :  { %v370_v48 = vadd.f32 %v1115_v51, %v369_v47  ;;  %v497_v49 = vadd.f32 %v496_v41, %v408_v46 }
 0x109   :  { %v459_v50 = vadd.f32 %v458_v24, %v370_v48  ;;  %v534_v53 = vmax.f32 %v497_v49, 0.0 }
 0x10b   :  { %v519_v54 = vmax.f32 %v459_v50, 0.0  ;;  %566 = vst [vmem:[#allocation2 + $0xe0] sm:$0xff] %v534_v53 }
 0x10c   :  { %v466_v56 = vpop.f32.mrf.mxu1  ;;  %v409_v59 = vpop.f32.mrf.mxu2 }
 0x10d   :  { %v467_v57 = vadd.f32 %v466_v56, %v378_v52  ;;  %551 = vst [vmem:[#allocation2 + $0x68] sm:$0xff] %v519_v54  ;;  %v410_v61 = vadd.f32 %v1115_v51, %v409_v59 }
 0x10e   :  { %v372_v62 = vpop.f32.mrf.mxu0 }
 0x10f   :  { %v522_v60 = vmax.f32 %v467_v57, 0.0  ;;  %v373_v63 = vadd.f32 %v1115_v51, %v372_v62  ;;  %v499_v0 = vadd.f32 %v498_v55, %v410_v61 }
 0x111   :  { %554 = vst [vmem:[#allocation2 + $0x80] sm:$0xff] %v522_v60  ;;  %v462_v2 = vadd.f32 %v461_v34, %v373_v63  ;;  %v535_v3 = vmax.f32 %v499_v0, 0.0 }
 0x113   :  { %v520_v4 = vmax.f32 %v462_v2, 0.0  ;;  %567 = vst [vmem:[#allocation2 + $0xe8] sm:$0xff] %v535_v3 }
 0x114   :  { %v468_v5 = vpop.f32.mrf.mxu1  ;;  %v412_v8 = vpop.f32.mrf.mxu2 }
 0x115   :  { %v469_v6 = vadd.f32 %v468_v5, %v380_v58  ;;  %552 = vst [vmem:[#allocation2 + $0x70] sm:$0xff] %v520_v4  ;;  %v413_v10 = vadd.f32 %v1115_v51, %v412_v8 }
 0x116   :  { %v374_v11 = vpop.f32.mrf.mxu0 }
 0x117   :  { %v523_v9 = vmax.f32 %v469_v6, 0.0  ;;  %v375_v12 = vadd.f32 %v1115_v51, %v374_v11  ;;  %v502_v13 = vadd.f32 %v501_v7, %v413_v10 }
 0x119   :  { %555 = vst [vmem:[#allocation2 + $0x88] sm:$0xff] %v523_v9  ;;  %v464_v14 = vadd.f32 %v463_v44, %v375_v12  ;;  %v536_v15 = vmax.f32 %v502_v13, 0.0 }
 0x11b   :  { %v521_v16 = vmax.f32 %v464_v14, 0.0  ;;  %568 = vst [vmem:[#allocation2 + $0xf0] sm:$0xff] %v536_v15 }
 0x11c   :  { %v414_v1 = vpop.f32.mrf.mxu2 }
 0x11d   :  { %553 = vst [vmem:[#allocation2 + $0x78] sm:$0xff] %v521_v16  ;;  %v415_v17 = vadd.f32 %v1115_v51, %v414_v1 }
 0x11f   :  { %v504_v19 = vadd.f32 %v503_v18, %v415_v17 }
 0x121   :  { %v537_v20 = vmax.f32 %v504_v19, 0.0 }
 0x123   :  { %569 = vst [vmem:[#allocation2 + $0xf8] sm:$0xff] %v537_v20 }
 0x124   :  { %582 = dma.vmem_to_hbm [thread:$0]  %s575_s2, 4096, %s577_s25, [#allocation3], %s852_s26, %s852_s26, %s853_s27  }
 0x125   :  { %848 = dma.done.wait [#allocation3], 4096  }
 0x126   :  { %849 = vsyncadd [#allocation3], 4294963200 }
 0x127   :  { %587 = vsyncpa [#allocation3], 1 }

</bundles_post_ra>
